<compile_context>
chip_gen: v7x
topology: tpu7x:2x2x1
jax: 0.10.0
libtpu: 0.0.40
codegen_flags: <defaults>
</compile_context>

<pallas_src>
import jax
import jax.numpy as jnp
from jax.experimental import pallas as pl
from jax.experimental.pallas import tpu as pltpu


D_IN = 4             # SharedMLP input features
D_HID = 8            # hidden width
EPR = 128 // D_IN    # batch elements packed per 128-lane row (= 32)
MIN_TILE = 8 * EPR   # smallest legal batch tile: 8 sublanes * 32 elems = 256


def shared_mlp_kernel(x_ref, w1e_ref, b1e_ref, w2e_ref, b2e_ref,
                      w3e_ref, b3e_ref, o1_ref, o2_ref):
    # x_ref  : (TR, 128)  packed input, lane l -> element l//4, feature l%4
    # w1e_ref: (128, 256) block-diagonal I_32 (x) W1^T           (resident)
    # b1e_ref: (1, 256)   b1 tiled per packed element            (resident)
    # w2e/w3e: (256, 32)  block-diagonal head weights            (resident)
    # b2e/b3e: (1, 32)    head biases broadcast over lanes       (resident)
    # o1/o2  : (TR, 32)   packed head outputs, lane = packed element index
    h = jnp.dot(x_ref[...], w1e_ref[...], preferred_element_type=jnp.float32)
    h = jnp.maximum(h + b1e_ref[...], 0.0)
    o1_ref[...] = (jnp.dot(h, w2e_ref[...], preferred_element_type=jnp.float32)
                   + b2e_ref[...]).astype(o1_ref.dtype)
    o2_ref[...] = (jnp.dot(h, w3e_ref[...], preferred_element_type=jnp.float32)
                   + b3e_ref[...]).astype(o2_ref.dtype)


def _vmem_capacity_bytes():
    try:
        cap = getattr(pltpu.get_tpu_info(), "vmem_capacity_bytes", None)
        if cap:
            return int(cap)
    except Exception:
        pass
    return 64 << 20  # conservative default: v7x has 64 MiB per TensorCore


def shared_mlp(x, w1, b1, w2, b2, w3, b3, *, tile_b=None):
    """x: (n, 4) float32; weights/biases in PyTorch convention:
    w1 (8, 4), b1 (8,), w2 (1, 8), b2 (1,), w3 (1, 8), b3 (1,).
    Returns (out1, out2), each (n, 1) -- identical to SharedMLP.forward."""
    n, d_in = x.shape
    assert d_in == D_IN and w1.shape == (D_HID, D_IN)

    vmem_cap = _vmem_capacity_bytes()

    # --- generation-tiered batch tile (review item 1) ----------------------
    if tile_b is None:
        # 256K elements on 128-MiB-VMEM chips (v5e/v6e), 128K on v7x (64 MiB/TC).
        tile_b = 262144 if vmem_cap >= (96 << 20) else 131072
    # Round to a multiple of MIN_TILE (keeps the (8,128) BlockSpec rule) and
    # clamp so the ~192 B/elem VMEM working set fits under the chip's VMEM.
    max_tile = max(((vmem_cap - (16 << 20)) // 192) // MIN_TILE * MIN_TILE, MIN_TILE)
    tile_b = max(MIN_TILE, (int(tile_b) // MIN_TILE) * MIN_TILE)
    tile_b = min(tile_b, max_tile)
    n_ceil = pl.cdiv(n, MIN_TILE) * MIN_TILE
    tile_b = min(tile_b, n_ceil)

    n_pad = pl.cdiv(n, tile_b) * tile_b
    # For batch sizes aligned to tile_b this pad (an extra HBM pass over x)
    # disappears entirely; only ragged batches pay it once.
    xp = x if n_pad == n else jnp.pad(x, ((0, n_pad - n), (0, 0)))
    # Zero-copy packed view: row-major (n_pad, 4) -> (n_pad//32, 128).
    xp = xp.reshape(n_pad // EPR, EPR * D_IN)

    # --- block-diagonal "expanded" weights: I_32 (x) W^T --------------------
    # They make each per-row matmul act independently on the 32 packed
    # elements, so x never needs a transpose / de-interleave.  (Tiny one-time
    # cost; under jit you would hoist/precompute these per parameter set.)
    f32 = x.dtype
    eye = jnp.eye(EPR, dtype=f32)
    w1e = jnp.einsum("ab,jf->afbj", eye, w1).reshape(D_IN * EPR, D_HID * EPR)   # (128,256)
    b1e = jnp.tile(b1, EPR).reshape(1, D_HID * EPR)                             # (1,256)
    w2e = jnp.einsum("ab,j->ajb", eye, w2[0]).reshape(D_HID * EPR, EPR)         # (256,32)
    w3e = jnp.einsum("ab,j->ajb", eye, w3[0]).reshape(D_HID * EPR, EPR)         # (256,32)
    b2e = jnp.full((1, EPR), b2[0], f32)
    b3e = jnp.full((1, EPR), b3[0], f32)

    tile_rows = tile_b // EPR
    rows_pad = n_pad // EPR
    grid = (rows_pad // tile_rows,)

    # ~192 B/elem working set (packed x + two lane-padded head outputs, both
    # double-buffered, + the (tile_rows, 256) f32 hidden intermediate) + margin.
    vmem_limit = int(min(max(192 * tile_b + (16 << 20), 32 << 20), vmem_cap))

    out1p, out2p = pl.pallas_call(
        shared_mlp_kernel,
        out_shape=(jax.ShapeDtypeStruct((rows_pad, EPR), f32),
                   jax.ShapeDtypeStruct((rows_pad, EPR), f32)),
        grid_spec=pltpu.PrefetchScalarGridSpec(
            num_scalar_prefetch=0,
            grid=grid,
            in_specs=[
                pl.BlockSpec((tile_rows, D_IN * EPR), lambda i: (i, 0)),    # packed x
                pl.BlockSpec((D_IN * EPR, D_HID * EPR), lambda i: (0, 0)),  # W1 expanded
                pl.BlockSpec((1, D_HID * EPR), lambda i: (0, 0)),           # b1 expanded
                pl.BlockSpec((D_HID * EPR, EPR), lambda i: (0, 0)),         # head-1 W
                pl.BlockSpec((1, EPR), lambda i: (0, 0)),                   # head-1 b
                pl.BlockSpec((D_HID * EPR, EPR), lambda i: (0, 0)),         # head-2 W
                pl.BlockSpec((1, EPR), lambda i: (0, 0)),                   # head-2 b
            ],
            out_specs=(
                pl.BlockSpec((tile_rows, EPR), lambda i: (i, 0)),
                pl.BlockSpec((tile_rows, EPR), lambda i: (i, 0)),
            ),
        ),
        compiler_params=pltpu.CompilerParams(
            # Single batch axis; "parallel" lets the v7x megacore shard it
            # across its two TensorCores (no-op on single-TC v5e/v6e).
            dimension_semantics=("parallel",),
            vmem_limit_bytes=vmem_limit,
        ),
    )(xp, w1e, b1e, w2e, b2e, w3e, b3e)

    # Packed (rows, 32) -> (n_pad, 1) is a free contiguous reshape; only a
    # ragged batch pays the [:n] slice (padded tail elements hold relu(b1)
    # junk and must stay sliced off).
    out1 = out1p.reshape(n_pad, 1)
    out2 = out2p.reshape(n_pad, 1)
    if n_pad != n:
        out1, out2 = out1[:n], out2[:n]
    return out1, out2


def init_params(key):
    """Deterministic init mimicking PyTorch Linear default
    (uniform +/- 1/sqrt(fan_in)), stored in PyTorch-native (out, in) layout."""
    k1, k2, k3, k4, k5, k6 = jax.random.split(key, 6)

    def u(k, shape, fan_in):
        bound = 1.0 / jnp.sqrt(float(fan_in))
        return jax.random.uniform(k, shape, jnp.float32, -bound, bound)

    w1 = u(k1, (D_HID, D_IN), D_IN)   # Linear(4, 8) weight (out, in)
    b1 = u(k2, (D_HID,), D_IN)        # Linear(4, 8) bias
    w2 = u(k3, (1, D_HID), D_HID)     # output1 weight
    b2 = u(k4, (1,), D_HID)           # output1 bias
    w3 = u(k5, (1, D_HID), D_HID)     # output2 weight
    b3 = u(k6, (1,), D_HID)           # output2 bias
    return w1, b1, w2, b2, w3, b3


def _reference(x, w1, b1, w2, b2, w3, b3):
    hi = jax.lax.Precision.HIGHEST
    h = jnp.maximum(jnp.einsum("nf,jf->nj", x, w1, precision=hi) + b1, 0.0)
    o1 = jnp.einsum("nj,kj->nk", h, w2, precision=hi) + b2
    o2 = jnp.einsum("nj,kj->nk", h, w3, precision=hi) + b3
    return o1, o2


if __name__ == "__main__":
    key = jax.random.PRNGKey(0)
    kx1, kx2, kx3, kp = jax.random.split(key, 4)
    params = init_params(kp)

    def check(x, out1, out2, name):
        ref1, ref2 = _reference(x, *params)
        assert out1.shape == ref1.shape and out2.shape == ref2.shape, name
        assert jnp.allclose(out1, ref1, atol=1e-4, rtol=1e-4), f"{name}: head1 mismatch"
        assert jnp.allclose(out2, ref2, atol=1e-4, rtol=1e-4), f"{name}: head2 mismatch"

    # 1) Tiny batch (padded 8 -> 256), single grid step.
    x1 = jax.random.normal(kx1, (8, D_IN), dtype=jnp.float32)
    o1, o2 = shared_mlp(x1, *params)
    jax.block_until_ready((o1, o2))
    check(x1, o1, o2, "small")

    # 2) Ragged batch + explicit small tile -> multi-step grid (grid=(2,)),
    #    exercises padding and the [:n] slice path.
    x2 = jax.random.normal(kx2, (260, D_IN), dtype=jnp.float32)
    o1b, o2b = shared_mlp(x2, *params, tile_b=256)
    jax.block_until_ready((o1b, o2b))
    check(x2, o1b, o2b, "tiled")

    # 3) Aligned batch on the default (generation-tiered) tile path:
    #    no pad, no post-kernel slice.
    x3 = jax.random.normal(kx3, (1024, D_IN), dtype=jnp.float32)
    o1c, o2c = shared_mlp(x3, *params)
    jax.block_until_ready((o1c, o2c))
    check(x3, o1c, o2c, "default-tile")

    print("KERNEL_OK")
</pallas_src>

<mosaic_0001>
module attributes {stable_mosaic.version = 11 : i64} {
  func.func @shared_mlp_kernel(%arg0: i32, %arg1: memref<8x128xf32, #tpu.memory_space<vmem>>, %arg2: memref<128x256xf32, #tpu.memory_space<vmem>>, %arg3: memref<1x256xf32, #tpu.memory_space<vmem>>, %arg4: memref<256x32xf32, #tpu.memory_space<vmem>>, %arg5: memref<1x32xf32, #tpu.memory_space<vmem>>, %arg6: memref<256x32xf32, #tpu.memory_space<vmem>>, %arg7: memref<1x32xf32, #tpu.memory_space<vmem>>, %arg8: memref<8x32xf32, #tpu.memory_space<vmem>>, %arg9: memref<8x32xf32, #tpu.memory_space<vmem>>) attributes {dimension_semantics = [#tpu.dimension_semantics<parallel>], iteration_bounds = array<i64: 1>, scalar_prefetch = 0 : i64, scratch_operands = 0 : i64, tpu.core_type = #tpu.core_type<tc>, window_params = [{transform_indices = @transform_0, window_bounds = array<i64: 8, 128>}, {pipeline_mode = #tpu.pipeline_mode<synchronous>, transform_indices = @transform_1, window_bounds = array<i64: 128, 256>}, {pipeline_mode = #tpu.pipeline_mode<synchronous>, transform_indices = @transform_2, window_bounds = array<i64: 1, 256>}, {pipeline_mode = #tpu.pipeline_mode<synchronous>, transform_indices = @transform_3, window_bounds = array<i64: 256, 32>}, {pipeline_mode = #tpu.pipeline_mode<synchronous>, transform_indices = @transform_4, window_bounds = array<i64: 1, 32>}, {pipeline_mode = #tpu.pipeline_mode<synchronous>, transform_indices = @transform_5, window_bounds = array<i64: 256, 32>}, {pipeline_mode = #tpu.pipeline_mode<synchronous>, transform_indices = @transform_6, window_bounds = array<i64: 1, 32>}, {transform_indices = @transform_7, window_bounds = array<i64: 8, 32>}, {transform_indices = @transform_8, window_bounds = array<i64: 8, 32>}]} {
    %c0 = arith.constant 0 : index
    %c0_0 = arith.constant 0 : index
    %0 = vector.load %arg1[%c0, %c0_0] : memref<8x128xf32, #tpu.memory_space<vmem>>, vector<8x128xf32>
    %c0_1 = arith.constant 0 : index
    %c0_2 = arith.constant 0 : index
    %1 = vector.load %arg2[%c0_1, %c0_2] : memref<128x256xf32, #tpu.memory_space<vmem>>, vector<128x256xf32>
    %cst = arith.constant dense<0.000000e+00> : vector<8x256xf32>
    %2 = tpu.matmul %0, %1, %cst {dimension_numbers = #tpu.dot_dimension_numbers<[1], [0], [0], [1], [0, 0, 1, 1], [], []>} : vector<8x128xf32>, vector<128x256xf32>, vector<8x256xf32> -> vector<8x256xf32>
    %c0_3 = arith.constant 0 : index
    %c0_4 = arith.constant 0 : index
    %3 = vector.load %arg3[%c0_3, %c0_4] : memref<1x256xf32, #tpu.memory_space<vmem>>, vector<1x256xf32>
    %4 = vector.broadcast %3 : vector<1x256xf32> to vector<8x256xf32>
    %5 = arith.addf %2, %4 : vector<8x256xf32>
    %cst_5 = arith.constant 0.000000e+00 : f32
    %6 = vector.broadcast %cst_5 : f32 to vector<8x256xf32>
    %7 = arith.maximumf %5, %6 : vector<8x256xf32>
    %c0_6 = arith.constant 0 : index
    %c0_7 = arith.constant 0 : index
    %8 = vector.load %arg4[%c0_6, %c0_7] : memref<256x32xf32, #tpu.memory_space<vmem>>, vector<256x32xf32>
    %cst_8 = arith.constant dense<0.000000e+00> : vector<8x32xf32>
    %9 = tpu.matmul %7, %8, %cst_8 {dimension_numbers = #tpu.dot_dimension_numbers<[1], [0], [0], [1], [0, 0, 1, 1], [], []>} : vector<8x256xf32>, vector<256x32xf32>, vector<8x32xf32> -> vector<8x32xf32>
    %c0_9 = arith.constant 0 : index
    %c0_10 = arith.constant 0 : index
    %10 = vector.load %arg5[%c0_9, %c0_10] : memref<1x32xf32, #tpu.memory_space<vmem>>, vector<1x32xf32>
    %11 = vector.broadcast %10 : vector<1x32xf32> to vector<8x32xf32>
    %12 = arith.addf %9, %11 : vector<8x32xf32>
    %c0_11 = arith.constant 0 : index
    %c0_12 = arith.constant 0 : index
    %13 = vector.load %arg8[%c0_11, %c0_12] : memref<8x32xf32, #tpu.memory_space<vmem>>, vector<8x32xf32>
    tpu.vector_store %arg8[%c0_11, %c0_12], %12 {strides = array<i32>} : memref<8x32xf32, #tpu.memory_space<vmem>>, vector<8x32xf32>,
    %c0_13 = arith.constant 0 : index
    %c0_14 = arith.constant 0 : index
    %14 = vector.load %arg6[%c0_13, %c0_14] : memref<256x32xf32, #tpu.memory_space<vmem>>, vector<256x32xf32>
    %cst_15 = arith.constant dense<0.000000e+00> : vector<8x32xf32>
    %15 = tpu.matmul %7, %14, %cst_15 {dimension_numbers = #tpu.dot_dimension_numbers<[1], [0], [0], [1], [0, 0, 1, 1], [], []>} : vector<8x256xf32>, vector<256x32xf32>, vector<8x32xf32> -> vector<8x32xf32>
    %c0_16 = arith.constant 0 : index
    %c0_17 = arith.constant 0 : index
    %16 = vector.load %arg7[%c0_16, %c0_17] : memref<1x32xf32, #tpu.memory_space<vmem>>, vector<1x32xf32>
    %17 = vector.broadcast %16 : vector<1x32xf32> to vector<8x32xf32>
    %18 = arith.addf %15, %17 : vector<8x32xf32>
    %c0_18 = arith.constant 0 : index
    %c0_19 = arith.constant 0 : index
    %19 = vector.load %arg9[%c0_18, %c0_19] : memref<8x32xf32, #tpu.memory_space<vmem>>, vector<8x32xf32>
    tpu.vector_store %arg9[%c0_18, %c0_19], %18 {strides = array<i32>} : memref<8x32xf32, #tpu.memory_space<vmem>>, vector<8x32xf32>,
    return
  }
  func.func @transform_0(%arg0: i32) -> (i32, i32) {
    %c0_i32 = arith.constant 0 : i32
    %c0_i32_0 = arith.constant 0 : i32
    return %arg0, %c0_i32 : i32, i32
  }
  func.func @transform_1(%arg0: i32) -> (i32, i32) {
    %c0_i32 = arith.constant 0 : i32
    %c0_i32_0 = arith.constant 0 : i32
    %c0_i32_1 = arith.constant 0 : i32
    return %c0_i32, %c0_i32_0 : i32, i32
  }
  func.func @transform_2(%arg0: i32) -> (i32, i32) {
    %c0_i32 = arith.constant 0 : i32
    %c0_i32_0 = arith.constant 0 : i32
    %c0_i32_1 = arith.constant 0 : i32
    return %c0_i32, %c0_i32_0 : i32, i32
  }
  func.func @transform_3(%arg0: i32) -> (i32, i32) {
    %c0_i32 = arith.constant 0 : i32
    %c0_i32_0 = arith.constant 0 : i32
    %c0_i32_1 = arith.constant 0 : i32
    return %c0_i32, %c0_i32_0 : i32, i32
  }
  func.func @transform_4(%arg0: i32) -> (i32, i32) {
    %c0_i32 = arith.constant 0 : i32
    %c0_i32_0 = arith.constant 0 : i32
    %c0_i32_1 = arith.constant 0 : i32
    return %c0_i32, %c0_i32_0 : i32, i32
  }
  func.func @transform_5(%arg0: i32) -> (i32, i32) {
    %c0_i32 = arith.constant 0 : i32
    %c0_i32_0 = arith.constant 0 : i32
    %c0_i32_1 = arith.constant 0 : i32
    return %c0_i32, %c0_i32_0 : i32, i32
  }
  func.func @transform_6(%arg0: i32) -> (i32, i32) {
    %c0_i32 = arith.constant 0 : i32
    %c0_i32_0 = arith.constant 0 : i32
    %c0_i32_1 = arith.constant 0 : i32
    return %c0_i32, %c0_i32_0 : i32, i32
  }
  func.func @transform_7(%arg0: i32) -> (i32, i32) {
    %c0_i32 = arith.constant 0 : i32
    %c0_i32_0 = arith.constant 0 : i32
    return %arg0, %c0_i32 : i32, i32
  }
  func.func @transform_8(%arg0: i32) -> (i32, i32) {
    %c0_i32 = arith.constant 0 : i32
    %c0_i32_0 = arith.constant 0 : i32
    return %arg0, %c0_i32 : i32, i32
  }
}

</mosaic_0001>

<bundles_post_ra>
// kernel: tpu_custom_call.1
= control target key start
LH: loop header
LB: loop body
LE: loop exit
PB: predicated region body
PF: predicated region fallthrough
CT: control target
= control target key end

     0   :  { %14 = vsyncpa [#allocation3], 0  ;;  %v616_v7 = vmov 0.0   ;;  %s988_s0 = inlined_call_operand.vmem [shape: f32[8,128], index: 0, kind: input, shape index: {}]   ;;  %s989_s1 = inlined_call_operand.vmem [shape: f32[128,256], index: 1, kind: input, shape index: {}]   ;;  %s990_s2 = inlined_call_operand.vmem [shape: f32[1,256], index: 2, kind: input, shape index: {}]   ;;  %s991_s3 = inlined_call_operand.vmem [shape: f32[256,32], index: 3, kind: input, shape index: {}]   ;;  %s992_s4 = inlined_call_operand.vmem [shape: f32[1,32], index: 4, kind: input, shape index: {}]   ;;  %s993_s5 = inlined_call_operand.vmem [shape: f32[256,32], index: 5, kind: input, shape index: {}]   ;;  %s994_s6 = inlined_call_operand.vmem [shape: f32[1,32], index: 6, kind: input, shape index: {}]   ;;  %s995_s7 = inlined_call_operand.hbm [shape: f32[8,32], index: 7, kind: output, shape index: {0}]   ;;  %s996_s8 = inlined_call_operand.hbm [shape: f32[8,32], index: 8, kind: output, shape index: {1}]  }
   0x1   :  { %v32_v0 = vld [vmem:[%s989_s1 + $0x8] sm:$0xff]  ;;  %v34_v1 = vld [vmem:[%s989_s1 + $0x18] sm:$0xff]  ;;  %v31_v2 = vld [vmem:[%s989_s1] sm:$0xff]  ;;  %139 = vmatprep.mubr.f32.mxu0 %v616_v7 }
   0x2   :  { %v469_v3 = vpack.c.bf16 %v34_v1, %v32_v0  ;;  %v33_v4 = vld [vmem:[%s989_s1 + $0x10] sm:$0xff]  ;;  %v36_v5 = vld [vmem:[%s989_s1 + $0x28] sm:$0xff]  ;;  %v38_v6 = vld [vmem:[%s989_s1 + $0x38] sm:$0xff] }
   0x3   :  { %v471_v8 = vpack.c.bf16 %v33_v4, %v31_v2  ;;  %v473_v9 = vpack.c.bf16 %v38_v6, %v36_v5  ;;  %v35_v10 = vld [vmem:[%s989_s1 + $0x20] sm:$0xff]  ;;  %v37_v11 = vld [vmem:[%s989_s1 + $0x30] sm:$0xff]  ;;  %v40_v12 = vld [vmem:[%s989_s1 + $0x48] sm:$0xff] }
   0x4   :  { %470 = vmatprep.subr.bf16.mxu0 %v469_v3  ;;  %v42_v13 = vld [vmem:[%s989_s1 + $0x58] sm:$0xff]  ;;  %v475_v14 = vpack.c.bf16 %v37_v11, %v35_v10  ;;  %v39_v16 = vld [vmem:[%s989_s1 + $0x40] sm:$0xff]  ;;  %v41_v17 = vld [vmem:[%s989_s1 + $0x50] sm:$0xff] }
   0x5   :  { %472 = vmatpush1.bf16.msra.mxu0 %v471_v8  ;;  %v477_v15 = vpack.c.bf16 %v42_v13, %v40_v12  ;;  %v44_v18 = vld [vmem:[%s989_s1 + $0x68] sm:$0xff]  ;;  %v46_v19 = vld [vmem:[%s989_s1 + $0x78] sm:$0xff]  ;;  %v479_v20 = vpack.c.bf16 %v41_v17, %v39_v16  ;;  %v43_v22 = vld [vmem:[%s989_s1 + $0x60] sm:$0xff] }
   0x6   :  { %474 = vmatprep.subr.bf16.mxu0 %v473_v9  ;;  %v481_v21 = vpack.c.bf16 %v46_v19, %v44_v18  ;;  %v45_v23 = vld [vmem:[%s989_s1 + $0x70] sm:$0xff]  ;;  %v48_v24 = vld [vmem:[%s989_s1 + $0x88] sm:$0xff]  ;;  %v50_v25 = vld [vmem:[%s989_s1 + $0x98] sm:$0xff] }
   0x7   :  { %v164_v26 = vld [vmem:[%s991_s3 + $0x80] sm:$0xff]  ;;  %v165_v27 = vld [vmem:[%s991_s3 + $0x88] sm:$0xff]  ;;  %v483_v28 = vpack.c.bf16 %v45_v23, %v43_v22  ;;  %v485_v32 = vpack.c.bf16 %v50_v25, %v48_v24  ;;  %v49_v34 = vld [vmem:[%s989_s1 + $0x90] sm:$0xff] }
   0x8   :  { %v501_v29 = vpack.c.bf16 %v165_v27, %v164_v26  ;;  %v148_v30 = vld [vmem:[%s991_s3] sm:$0xff]  ;;  %v149_v31 = vld [vmem:[%s991_s3 + $0x8] sm:$0xff]  ;;  %v166_v36 = vld [vmem:[%s991_s3 + $0x90] sm:$0xff] }
   0x9   :  { %476 = vmatpush1.bf16.msra.mxu0 %v475_v14  ;;  %v47_v33 = vld [vmem:[%s989_s1 + $0x80] sm:$0xff]  ;;  %v503_v35 = vpack.c.bf16 %v149_v31, %v148_v30  ;;  %v52_v37 = vld [vmem:[%s989_s1 + $0xa8] sm:$0xff]  ;;  %v54_v38 = vld [vmem:[%s989_s1 + $0xb8] sm:$0xff] }
   0xa   :  { %478 = vmatprep.subr.bf16.mxu0 %v477_v15  ;;  %502 = vmatprep.subr.bf16.mxu1 %v501_v29  ;;  %v167_v39 = vld [vmem:[%s991_s3 + $0x98] sm:$0xff]  ;;  %v150_v41 = vld [vmem:[%s991_s3 + $0x10] sm:$0xff]  ;;  %v487_v43 = vpack.c.bf16 %v49_v34, %v47_v33  ;;  %v168_v45 = vld [vmem:[%s991_s3 + $0xa0] sm:$0xff]  ;;  %v489_v47 = vpack.c.bf16 %v54_v38, %v52_v37 }
   0xb   :  { %504 = vmatpush3.bf16.msra.mxu1 %v503_v35  ;;  %v505_v40 = vpack.c.bf16 %v167_v39, %v166_v36  ;;  %v151_v42 = vld [vmem:[%s991_s3 + $0x18] sm:$0xff]  ;;  %v169_v46 = vld [vmem:[%s991_s3 + $0xa8] sm:$0xff]  ;;  %v51_v48 = vld [vmem:[%s989_s1 + $0xa0] sm:$0xff] }
   0xc   :  { %v507_v44 = vpack.c.bf16 %v151_v42, %v150_v41  ;;  %v53_v49 = vld [vmem:[%s989_s1 + $0xb0] sm:$0xff]  ;;  %v509_v50 = vpack.c.bf16 %v169_v46, %v168_v45  ;;  %v152_v51 = vld [vmem:[%s991_s3 + $0x20] sm:$0xff]  ;;  %v56_v52 = vld [vmem:[%s989_s1 + $0xc8] sm:$0xff] }
   0xd   :  { %480 = vmatpush1.bf16.msra.mxu0 %v479_v20  ;;  %506 = vmatprep.subr.bf16.mxu1 %v505_v40  ;;  %v58_v53 = vld [vmem:[%s989_s1 + $0xd8] sm:$0xff]  ;;  %v153_v54 = vld [vmem:[%s991_s3 + $0x28] sm:$0xff]  ;;  %v170_v56 = vld [vmem:[%s991_s3 + $0xb0] sm:$0xff]  ;;  %v491_v58 = vpack.c.bf16 %v53_v49, %v51_v48 }
   0xe   :  { %482 = vmatprep.subr.bf16.mxu0 %v481_v21  ;;  %v511_v55 = vpack.c.bf16 %v153_v54, %v152_v51  ;;  %v171_v57 = vld [vmem:[%s991_s3 + $0xb8] sm:$0xff]  ;;  %v154_v60 = vld [vmem:[%s991_s3 + $0x30] sm:$0xff]  ;;  %v493_v62 = vpack.c.bf16 %v58_v53, %v56_v52  ;;  %v55_v63 = vld [vmem:[%s989_s1 + $0xc0] sm:$0xff] }
   0xf   :  { %508 = vmatpush3.bf16.msra.mxu1 %v507_v44  ;;  %v513_v59 = vpack.c.bf16 %v171_v57, %v170_v56  ;;  %v155_v61 = vld [vmem:[%s991_s3 + $0x38] sm:$0xff]  ;;  %v57_v0 = vld [vmem:[%s989_s1 + $0xd0] sm:$0xff]  ;;  %v172_v1 = vld [vmem:[%s991_s3 + $0xc0] sm:$0xff] }
  0x10   :  { %510 = vmatprep.subr.bf16.mxu1 %v509_v50  ;;  %v60_v2 = vld [vmem:[%s989_s1 + $0xe8] sm:$0xff]  ;;  %v62_v3 = vld [vmem:[%s989_s1 + $0xf8] sm:$0xff]  ;;  %v515_v5 = vpack.c.bf16 %v155_v61, %v154_v60  ;;  %v495_v6 = vpack.c.bf16 %v57_v0, %v55_v63  ;;  %v59_v7 = vld [vmem:[%s989_s1 + $0xe0] sm:$0xff] }
  0x11   :  { %484 = vmatpush1.bf16.msra.mxu0 %v483_v28  ;;  %v173_v4 = vld [vmem:[%s991_s3 + $0xc8] sm:$0xff]  ;;  %v156_v9 = vld [vmem:[%s991_s3 + $0x40] sm:$0xff]  ;;  %v497_v11 = vpack.c.bf16 %v62_v3, %v60_v2  ;;  %v61_v12 = vld [vmem:[%s989_s1 + $0xf0] sm:$0xff] }
  0x12   :  { %486 = vmatprep.subr.bf16.mxu0 %v485_v32  ;;  %v517_v8 = vpack.c.bf16 %v173_v4, %v172_v1  ;;  %v157_v10 = vld [vmem:[%s991_s3 + $0x48] sm:$0xff]  ;;  %v174_v13 = vld [vmem:[%s991_s3 + $0xd0] sm:$0xff]  ;;  %v175_v14 = vld [vmem:[%s991_s3 + $0xd8] sm:$0xff]  ;;  %v499_v19 = vpack.c.bf16 %v61_v12, %v59_v7 }
  0x13   :  { %512 = vmatpush3.bf16.msra.mxu1 %v511_v55  ;;  %v275_v15 = vld [vmem:[%s993_s5 + $0x80] sm:$0xff]  ;;  %v276_v16 = vld [vmem:[%s993_s5 + $0x88] sm:$0xff]  ;;  %v519_v18 = vpack.c.bf16 %v157_v10, %v156_v9  ;;  %v521_v20 = vpack.c.bf16 %v175_v14, %v174_v13  ;;  %v158_v21 = vld [vmem:[%s991_s3 + $0x50] sm:$0xff] }
  0x14   :  { %514 = vmatprep.subr.bf16.mxu1 %v513_v59  ;;  %v259_v17 = vld [vmem:[%s993_s5] sm:$0xff]  ;;  %v159_v22 = vld [vmem:[%s991_s3 + $0x58] sm:$0xff] }
  0x15   :  { %488 = vmatpush1.bf16.msra.mxu0 %v487_v43 }
  0x16   :  { %490 = vmatprep.subr.bf16.mxu0 %v489_v47 }
  0x17   :  { %516 = vmatpush3.bf16.msra.mxu1 %v515_v5 }
  0x18   :  { %518 = vmatprep.subr.bf16.mxu1 %v517_v8 }
  0x19   :  { %492 = vmatpush1.bf16.msra.mxu0 %v491_v58 }
  0x1a   :  { %494 = vmatprep.subr.bf16.mxu0 %v493_v62 }
  0x1d   :  { %496 = vmatpush1.bf16.msra.mxu0 %v495_v6 }
  0x1e   :  { %15 = vsyncpa [#allocation5], 0  ;;  %498 = vmatprep.subr.bf16.mxu0 %v497_v11  ;;  %v533_v23 = vpack.c.bf16 %v276_v16, %v275_v15  ;;  %v260_v24 = vld [vmem:[%s993_s5 + $0x8] sm:$0xff]  ;;  %v176_v25 = vld [vmem:[%s991_s3 + $0xe0] sm:$0xff]  ;;  %520 = vmatpush3.bf16.msra.mxu1 %v519_v18  ;;  %v523_v29 = vpack.c.bf16 %v159_v22, %v158_v21  ;;  %v65_v18 = vlaneseq  ;;  %s617_s19 = smov [#allocation2]   ;;  %s618_s21 = smov [#allocation4]  }
  0x1f   :  { %v177_v26 = vld [vmem:[%s991_s3 + $0xe8] sm:$0xff]  ;;  %v277_v27 = vld [vmem:[%s993_s5 + $0x90] sm:$0xff]  ;;  %v278_v28 = vld [vmem:[%s993_s5 + $0x98] sm:$0xff]  ;;  %v535_v31 = vpack.c.bf16 %v260_v24, %v259_v17  ;;  %522 = vmatprep.subr.bf16.mxu1 %v521_v20  ;;  %s375_s20 = sshll.u32 %s617_s19, 4  ;;  %s385_s22 = sshll.u32 %s618_s21, 4  ;;  %vm257_vm0 = vcmask 261120   ;;  %s376_s20 = int_to_ptr.vmem [resolvable:$true] %s375_s20  ;;  %s386_s22 = int_to_ptr.vmem [resolvable:$true] %s385_s22 }
  0x20   :  { %v30_v30 = vld [vmem:[%s988_s0] sm:$0xff]  ;;  %v525_v32 = vpack.c.bf16 %v177_v26, %v176_v25  ;;  %v537_v33 = vpack.c.bf16 %v278_v28, %v277_v27  ;;  %v261_v34 = vld [vmem:[%s993_s5 + $0x10] sm:$0xff]  ;;  %v262_v35 = vld [vmem:[%s993_s5 + $0x18] sm:$0xff]  ;;  %p573_p1 = scmp.lt.s32.totalorder %s376_s20, %s376_s20 }
  0x21   :  { %500 = vmatpush1.bf16.msra.mxu0 %v499_v19  ;;  %v279_v36 = vld [vmem:[%s993_s5 + $0xa0] sm:$0xff]  ;;  %v280_v37 = vld [vmem:[%s993_s5 + $0xa8] sm:$0xff]  ;;  %v539_v38 = vpack.c.bf16 %v262_v35, %v261_v34  ;;  %v281_v42 = vld [vmem:[%s993_s5 + $0xb0] sm:$0xff]  ;;  %v66_v19 = vshrl.u32 %v65_v18, 7 }
  0x22   :  { %534 = vmatprep.subr.bf16.mxu0 %v533_v23  ;;  %524 = vmatpush3.bf16.msra.mxu1 %v523_v29  ;;  %v541_v39 = vpack.c.bf16 %v280_v37, %v279_v36  ;;  %v263_v40 = vld [vmem:[%s993_s5 + $0x20] sm:$0xff]  ;;  %v264_v41 = vld [vmem:[%s993_s5 + $0x28] sm:$0xff]  ;;  %v282_v43 = vld [vmem:[%s993_s5 + $0xb8] sm:$0xff] }
  0x23   :  { %526 = vmatprep.subr.bf16.mxu1 %v525_v32  ;;  %v543_v44 = vpack.c.bf16 %v264_v41, %v263_v40  ;;  %v545_v45 = vpack.c.bf16 %v282_v43, %v281_v42  ;;  %v265_v46 = vld [vmem:[%s993_s5 + $0x30] sm:$0xff]  ;;  %v266_v47 = vld [vmem:[%s993_s5 + $0x38] sm:$0xff]  ;;  %v283_v48 = vld [vmem:[%s993_s5 + $0xc0] sm:$0xff]  ;;  %v67_v20 = vsub.s32 0, %v66_v19  ;;  %v71_v22 = vsub.s32 1, %v66_v19 }
  0x24   :  { %140 = vmatmul.mubr.f32.vlgmr.msra.gmra.mrb[0].mxu0 %v30_v30  ;;  %v284_v49 = vld [vmem:[%s993_s5 + $0xc8] sm:$0xff]  ;;  %v547_v50 = vpack.c.bf16 %v266_v47, %v265_v46  ;;  %v267_v52 = vld [vmem:[%s993_s5 + $0x40] sm:$0xff]  ;;  %v285_v54 = vld [vmem:[%s993_s5 + $0xd0] sm:$0xff] }
  0x25   :  { %536 = vmatpush3.bf16.msra.mxu0 %v535_v31  ;;  %v549_v51 = vpack.c.bf16 %v284_v49, %v283_v48  ;;  %v268_v53 = vld [vmem:[%s993_s5 + $0x48] sm:$0xff]  ;;  %v286_v55 = vld [vmem:[%s993_s5 + $0xd8] sm:$0xff]  ;;  %v269_v58 = vld [vmem:[%s993_s5 + $0x50] sm:$0xff] }
  0x26   :  { %538 = vmatprep.subr.bf16.mxu0 %v537_v33  ;;  %v551_v56 = vpack.c.bf16 %v268_v53, %v267_v52  ;;  %v553_v57 = vpack.c.bf16 %v286_v55, %v285_v54  ;;  %v270_v59 = vld [vmem:[%s993_s5 + $0x58] sm:$0xff]  ;;  %v287_v60 = vld [vmem:[%s993_s5 + $0xe0] sm:$0xff]  ;;  %v288_v61 = vld [vmem:[%s993_s5 + $0xe8] sm:$0xff] }
  0x27   :  { %v555_v62 = vpack.c.bf16 %v270_v59, %v269_v58  ;;  %v557_v63 = vpack.c.bf16 %v288_v61, %v287_v60  ;;  %v160_v0 = vld [vmem:[%s991_s3 + $0x60] sm:$0xff]  ;;  %v161_v1 = vld [vmem:[%s991_s3 + $0x68] sm:$0xff]  ;;  %v178_v6 = vld [vmem:[%s991_s3 + $0xf0] sm:$0xff] }
  0x28   :  { %v271_v2 = vld [vmem:[%s993_s5 + $0x60] sm:$0xff]  ;;  %v527_v3 = vpack.c.bf16 %v161_v1, %v160_v0  ;;  %v272_v4 = vld [vmem:[%s993_s5 + $0x68] sm:$0xff]  ;;  %v179_v7 = vld [vmem:[%s991_s3 + $0xf8] sm:$0xff] }
  0x29   :  { %540 = vmatpush3.bf16.msra.mxu0 %v539_v38  ;;  %v559_v5 = vpack.c.bf16 %v272_v4, %v271_v2  ;;  %v289_v8 = vld [vmem:[%s993_s5 + $0xf0] sm:$0xff]  ;;  %v529_v9 = vpack.c.bf16 %v179_v7, %v178_v6  ;;  %v290_v10 = vld [vmem:[%s993_s5 + $0xf8] sm:$0xff]  ;;  %v63_v21 = vld [vmem:[%s990_s2] sm:$0x3] }
  0x2a   :  { %542 = vmatprep.subr.bf16.mxu0 %v541_v39  ;;  %528 = vmatpush3.bf16.msra.mxu1 %v527_v3  ;;  %v162_v11 = vld [vmem:[%s991_s3 + $0x70] sm:$0xff]  ;;  %v163_v12 = vld [vmem:[%s991_s3 + $0x78] sm:$0xff]  ;;  %v561_v13 = vpack.c.bf16 %v290_v10, %v289_v8  ;;  %v68_v23 = vrot.slane %v63_v21, %v67_v20  ;;  %v72_v24 = vrot.slane %v63_v21, %v71_v22  ;;  %v398_v33 = vld [vmem:[%s994_s6] ss:$0 sm:$0xff]  ;;  %s568_s6 = scalar_lea.vmem %s376_s20, 128 }
  0x2b   :  { %v531_v14 = vpack.c.bf16 %v163_v12, %v162_v11  ;;  %v273_v15 = vld [vmem:[%s993_s5 + $0x70] sm:$0xff]  ;;  %v274_v16 = vld [vmem:[%s993_s5 + $0x78] sm:$0xff]  ;;  %530 = vmatprep.subr.bf16.mxu1 %v529_v9  ;;  %v397_v36 = vld [vmem:[%s992_s4] ss:$0 sm:$0xff]  ;;  %p569_p0 = scmp.ne.s32.totalorder %s376_s20, %s568_s6  ;;  %p574_p2 = scmp.lt.s32.totalorder %s568_s6, %s568_s6 }
  0x2c   :  { %v563_v17 = vpack.c.bf16 %v274_v16, %v273_v15 }
  0x2d   :  { %544 = vmatpush3.bf16.msra.mxu0 %v543_v44  ;;  %p575_p3 = por %p574_p2, %p573_p1 }
  0x2e   :  { %546 = vmatprep.subr.bf16.mxu0 %v545_v45  ;;  %532 = vmatpush3.bf16.msra.mxu1 %v531_v14 }
  0x2f   :  { %p576_p4 = pnand %p575_p3, %p569_p0 }
  0x31   :  { %548 = vmatpush3.bf16.msra.mxu0 %v547_v50 }
  0x32   :  { %550 = vmatprep.subr.bf16.mxu0 %v549_v51 }
  0x35   :  { %552 = vmatpush3.bf16.msra.mxu0 %v551_v56 }
  0x36   :  { %554 = vmatprep.subr.bf16.mxu0 %v553_v57 }
  0x39   :  { %556 = vmatpush3.bf16.msra.mxu0 %v555_v62 }
  0x3a   :  { %558 = vmatprep.subr.bf16.mxu0 %v557_v63 }
  0x3d   :  { %560 = vmatpush3.bf16.msra.mxu0 %v559_v5 }
  0x3e   :  { %562 = vmatprep.subr.bf16.mxu0 %v561_v13 }
  0x41   :  { %564 = vmatpush3.bf16.msra.mxu0 %v563_v17 }
  0xf7   :  { %v141_v25 = vpop.f32.mrb[0].mxu0 }
  0xf8   :  { %v142_v26 = vadd.f32 %v141_v25, %v68_v23  ;;  %v143_v27 = vpop.f32.mrb[1].mxu0 }
  0xf9   :  { %v144_v28 = vadd.f32 %v143_v27, %v72_v24 }
  0xfa   :  { %v146_v30 = vmax.f32 %v142_v26, 0.0 }
  0xfb   :  { %v147_v29 = vmax.f32 %v144_v28, 0.0 }
  0xfd   :  { %251 = vmatprep.mubr.f32.mxu1 %v147_v29  ;;  %362 = vmatprep.mubr.f32.mxu0 %v147_v29 }
  0xfe   :  { %252 = vmatmul.mubr.f32.vlgmr.msra.gmra.mrb[0].mxu1 %v146_v30  ;;  %363 = vmatmul.mubr.f32.vlgmr.msra.gmra.mrb[2].mxu0 %v146_v30 }
 0x1d1   :  { %v431_v31 = vpop.f32.mrb[0].mxu1  ;;  %v466_v32 = vpop.f32.mrb[2].mxu0 }
 0x1d2   :  { %v432_v34 = vpop.f32.mrb[1].mxu1  ;;  %v467_v35 = vpop.f32.mrb[3].mxu0 }
 0x1d3   :  { %v433_v37 = vadd.f32 %v432_v34, %v431_v31  ;;  %v468_v38 = vadd.f32 %v467_v35, %v466_v32 }
 0x1d5   :  { %v365_v39 = vadd.f32 %v468_v38, %v398_v33  ;;  %v254_v40 = vadd.f32 %v433_v37, %v397_v36 }
 0x1d7   :  { %258 = vst.msk [vmem:[#allocation2] sm:$0xff] %vm257_vm0, %v254_v40  ;;  %368 = vst.msk [vmem:[#allocation4] sm:$0xff] %vm257_vm0, %v365_v39 }
 0x1d8   :  { %579 = shalt.err (!%p576_p4)
}
 0x1d9   :  { %s580_s24 = scalar_lea.hbm %s995_s7, 128 }
 0x1da   :  { %p581_p5 = scmp.ne.s32.totalorder %s995_s7, %s580_s24  ;;  %p584_p6 = scmp.lt.u32.totalorder %s580_s24, %s995_s7 }
 0x1dc   :  { %p586_p7 = pnand %p584_p6, %p581_p5 }
 0x1de   :  { %589 = shalt.err (!%p586_p7)
}
 0x1df   :  { %378 = dma.vmem_to_hbm [thread:$0]  %s376_s20, 128, %s995_s7, [#allocation3]  }
 0x1e0   :  { %s590_s1 = scalar_lea.vmem %s386_s22, 128  ;;  %p595_p9 = scmp.lt.s32.totalorder %s386_s22, %s386_s22 }
 0x1e1   :  { %p591_p8 = scmp.ne.s32.totalorder %s386_s22, %s590_s1  ;;  %p596_p10 = scmp.lt.s32.totalorder %s590_s1, %s590_s1 }
 0x1e3   :  { %p597_p11 = por %p596_p10, %p595_p9 }
 0x1e5   :  { %p598_p12 = pnand %p597_p11, %p591_p8 }
 0x1e7   :  { %601 = shalt.err (!%p598_p12)
}
 0x1e8   :  { %s602_s10 = scalar_lea.hbm %s996_s8, 128 }
 0x1e9   :  { %p603_p13 = scmp.ne.s32.totalorder %s996_s8, %s602_s10  ;;  %p606_p0 = scmp.lt.u32.totalorder %s602_s10, %s996_s8 }
 0x1eb   :  { %p608_p1 = pnand %p606_p0, %p603_p13 }
 0x1ed   :  { %611 = shalt.err (!%p608_p1)
}
 0x1ee   :  { %388 = dma.vmem_to_hbm [thread:$0]  %s386_s22, 128, %s996_s8, [#allocation5]  }
 0x1ef   :  { %612 = dma.done.wait [#allocation3], 128  }
 0x1f0   :  { %613 = vsyncadd [#allocation3], 4294967168 }
 0x1f1   :  { %614 = dma.done.wait [#allocation5], 128  }
 0x1f2   :  { %615 = vsyncadd [#allocation5], 4294967168 }
 0x1f3   :  { %395 = vsyncpa [#allocation3], 1 }
 0x1f4   :  { %396 = vsyncpa [#allocation5], 1 }

</bundles_post_ra>
